<compile_context>
chip_gen: v7x
topology: tpu7x:2x2x1
jax: 0.10.0
libtpu: 0.0.40
codegen_flags: <defaults>
</compile_context>

<pallas_src>
import functools

import jax
import jax.numpy as jnp
from jax import lax
from jax.experimental import pallas as pl
from jax.experimental.pallas import tpu as pltpu

LANE = 128                                  # lane-dense slab width for z / logp
VMEM_LIMIT = 48 * 1024 * 1024               # <= v7x 64 MiB/TC with headroom


def _adj_row_tile(n, elem_bytes=4, max_block_bytes=8 * 1024 * 1024, max_rows=256):
    """Rows per adj tile: multiple of 8 (sublane), byte-capped for VMEM."""
    if n <= max_rows or n % 8:
        return n                             # full axis (always a legal block)
    rows = max_block_bytes // (n * elem_bytes)
    return max(8, min(max_rows, (rows // 8) * 8))


def _prod_tile(n, target, align):
    """Tile for the z @ z.T output: multiple of `align`, or the full dim."""
    if n <= target or n % align:
        return n
    return (target // align) * align


# --------------------------- kernels ---------------------------------------

def _gcn_layer1_kernel(x_ref, w1_ref, b1_ref, adj_ref, h_ref):
    # One adj row tile: h_tile = relu((adj_tile @ x) @ W1 + b1)
    adj = adj_ref[...].astype(jnp.bfloat16)          # per-tile cast (VPU, hides under DMA)
    ax = jnp.dot(adj, x_ref[...].astype(jnp.bfloat16),
                 preferred_element_type=jnp.float32)
    h = jnp.dot(ax.astype(jnp.bfloat16), w1_ref[...].astype(jnp.bfloat16),
                preferred_element_type=jnp.float32)
    h_ref[...] = jnp.maximum(h + b1_ref[...], 0.0)


def _gcn_layer2_kernel(c_out, h_ref, w2_ref, b2_ref, adj_ref, z_ref, logp_ref):
    # One adj row tile: z_tile = (adj_tile @ h) @ W2_slab + b2_slab,
    # then row-wise log_softmax over the first c_out (real) feature columns.
    adj = adj_ref[...].astype(jnp.bfloat16)
    ah = jnp.dot(adj, h_ref[...].astype(jnp.bfloat16),
                 preferred_element_type=jnp.float32)
    z = jnp.dot(ah.astype(jnp.bfloat16), w2_ref[...].astype(jnp.bfloat16),
                preferred_element_type=jnp.float32) + b2_ref[...]
    z_ref[...] = z                                   # pad columns are exactly 0

    col = lax.broadcasted_iota(jnp.int32, z.shape, 1)
    zm = jnp.where(col < c_out, z, jnp.float32(-1e30))   # mask pad cols
    m = jnp.max(zm, axis=1, keepdims=True)
    e = jnp.exp(zm - m)                               # pad cols underflow to 0
    lse = jnp.log(jnp.sum(e, axis=1, keepdims=True)) + m
    logp_ref[...] = z - lse


def _inner_product_kernel(zi_ref, zj_ref, prod_ref):
    # prod tile (i, j) = z_i @ z_j.T, transpose-free (contract the lane axis).
    prod_ref[...] = lax.dot_general(
        zi_ref[...], zj_ref[...],
        dimension_numbers=(((1,), (1,)), ((), ())),
        preferred_element_type=jnp.float32)


# --------------------------- wrapper ----------------------------------------

def gcn_pignn_forward(x, adj, w1, b1, w2, b2):
    n, c_in = x.shape
    c_hid = w1.shape[1]
    c_out = w2.shape[1]
    assert adj.shape == (n, n)

    b1 = jnp.asarray(b1, jnp.float32).reshape(1, c_hid)
    # Zero-pad W2 / b2 once to the 128-lane slab width (tiny arrays): the pad
    # feature columns of z are then exactly zero, so the slab inner product
    # equals z @ z.T and the slab stores are lane-dense (unmasked vst).
    c_slab = max(LANE, c_out)
    w2_s = jnp.pad(jnp.asarray(w2, jnp.float32), ((0, 0), (0, c_slab - c_out)))
    b2_s = jnp.pad(jnp.asarray(b2, jnp.float32).reshape(1, c_out),
                   ((0, 0), (0, c_slab - c_out)))

    adj_bytes = adj.size * adj.dtype.itemsize
    params_1d = pltpu.CompilerParams(dimension_semantics=("parallel",),
                                     vmem_limit_bytes=VMEM_LIMIT)

    # ---------------- call 1: h = relu((adj @ x) @ W1 + b1) -----------------
    tm = _adj_row_tile(n, elem_bytes=adj.dtype.itemsize)
    g1 = pl.cdiv(n, tm)
    adj_kwargs = {"pipeline_mode": pl.Buffered(3)} if g1 > 2 else {}
    h = pl.pallas_call(
        _gcn_layer1_kernel,
        grid=(g1,),
        in_specs=[
            pl.BlockSpec((n, c_in), lambda i: (0, 0)),        # x (resident)
            pl.BlockSpec((c_in, c_hid), lambda i: (0, 0)),    # W1
            pl.BlockSpec((1, c_hid), lambda i: (0, 0)),       # b1
            pl.BlockSpec((tm, n), lambda i: (i, 0), **adj_kwargs),
        ],
        out_specs=pl.BlockSpec((tm, c_hid), lambda i: (i, 0)),
        out_shape=jax.ShapeDtypeStruct((n, c_hid), jnp.float32),
        cost_estimate=pl.CostEstimate(
            flops=2 * (n * n * c_in + n * c_in * c_hid),
            transcendentals=0,
            bytes_accessed=adj_bytes + (x.size + w1.size + c_hid + n * c_hid) * 4),
        compiler_params=params_1d,
    )(x, w1, b1, adj)

    # ------- call 2: z = (adj @ h) @ W2 + b2 ; logp = log_softmax(z) --------
    z_slab, logp_slab = pl.pallas_call(
        functools.partial(_gcn_layer2_kernel, c_out),
        grid=(g1,),
        in_specs=[
            pl.BlockSpec((n, c_hid), lambda i: (0, 0)),       # h (resident)
            pl.BlockSpec((c_hid, c_slab), lambda i: (0, 0)),  # W2 slab
            pl.BlockSpec((1, c_slab), lambda i: (0, 0)),      # b2 slab
            pl.BlockSpec((tm, n), lambda i: (i, 0), **adj_kwargs),
        ],
        out_specs=(
            pl.BlockSpec((tm, c_slab), lambda i: (i, 0)),     # z slab
            pl.BlockSpec((tm, c_slab), lambda i: (i, 0)),     # logp slab
        ),
        out_shape=(
            jax.ShapeDtypeStruct((n, c_slab), jnp.float32),
            jax.ShapeDtypeStruct((n, c_slab), jnp.float32),
        ),
        cost_estimate=pl.CostEstimate(
            flops=2 * (n * n * c_hid + n * c_hid * c_slab),
            transcendentals=n * (c_out + 1),
            bytes_accessed=adj_bytes + (n * c_hid + w2_s.size + c_slab
                                        + 2 * n * c_slab) * 4),
        compiler_params=params_1d,
    )(h, w2_s, b2_s, adj)

    # ------------------------ call 3: prod = z @ z.T ------------------------
    ti = _prod_tile(n, 256, 8)
    tj = _prod_tile(n, 512, 128)
    prod = pl.pallas_call(
        _inner_product_kernel,
        grid=(pl.cdiv(n, ti), pl.cdiv(n, tj)),
        in_specs=[
            pl.BlockSpec((ti, c_slab), lambda i, j: (i, 0)),
            pl.BlockSpec((tj, c_slab), lambda i, j: (j, 0)),
        ],
        out_specs=pl.BlockSpec((ti, tj), lambda i, j: (i, j)),
        out_shape=jax.ShapeDtypeStruct((n, n), jnp.float32),
        cost_estimate=pl.CostEstimate(
            flops=2 * n * n * c_slab,
            transcendentals=0,
            bytes_accessed=(2 * n * c_slab + n * n) * 4),
        compiler_params=pltpu.CompilerParams(
            dimension_semantics=("parallel", "parallel"),
            vmem_limit_bytes=VMEM_LIMIT),
    )(z_slab, z_slab)

    return logp_slab[:, :c_out], prod


# --------------------------- demo / self-test --------------------------------

if __name__ == "__main__":
    # Small shapes consistent with the module: N nodes, in=16 -> hidden=32 -> out=8
    N, C_IN, C_HID, C_OUT = 64, 16, 32, 8

    key = jax.random.PRNGKey(0)
    k_x, k_a, k_w1, k_b1, k_w2, k_b2 = jax.random.split(key, 6)

    x = jax.random.normal(k_x, (N, C_IN), dtype=jnp.float32)

    # Symmetric, row-normalized dense adjacency with self-loops.
    a = (jax.random.uniform(k_a, (N, N)) > 0.8).astype(jnp.float32)
    a = jnp.maximum(a, a.T) + jnp.eye(N, dtype=jnp.float32)
    deg = jnp.sum(a, axis=1, keepdims=True)
    adj = a / deg

    # Deterministic parameter init (Glorot-ish scaling).
    w1 = jax.random.normal(k_w1, (C_IN, C_HID), dtype=jnp.float32) * (1.0 / jnp.sqrt(C_IN))
    b1 = jax.random.normal(k_b1, (1, C_HID), dtype=jnp.float32) * 0.01
    w2 = jax.random.normal(k_w2, (C_HID, C_OUT), dtype=jnp.float32) * (1.0 / jnp.sqrt(C_HID))
    b2 = jax.random.normal(k_b2, (1, C_OUT), dtype=jnp.float32) * 0.01

    logp, prod = gcn_pignn_forward(x, adj, w1, b1, w2, b2)
    jax.block_until_ready((logp, prod))
    assert logp.shape == (N, C_OUT) and prod.shape == (N, N)
    assert jnp.all(jnp.isfinite(logp)) and jnp.all(jnp.isfinite(prod))

    # --- Check 1 (structural, tight): mirror of the kernel's bf16 MXU math ---
    adj_bf = adj.astype(jnp.bfloat16)
    ax_m = jnp.dot(adj_bf, x.astype(jnp.bfloat16), preferred_element_type=jnp.float32)
    h_m = jnp.maximum(
        jnp.dot(ax_m.astype(jnp.bfloat16), w1.astype(jnp.bfloat16),
                preferred_element_type=jnp.float32) + b1, 0.0)
    ah_m = jnp.dot(adj_bf, h_m.astype(jnp.bfloat16), preferred_element_type=jnp.float32)
    z_m = jnp.dot(ah_m.astype(jnp.bfloat16), w2.astype(jnp.bfloat16),
                  preferred_element_type=jnp.float32) + b2
    assert jnp.allclose(logp, jax.nn.log_softmax(z_m, axis=1), atol=1e-3, rtol=1e-3)
    assert jnp.allclose(prod, z_m @ z_m.T, atol=1e-3, rtol=1e-3)

    # --- Check 2 (fidelity, loose): the true f32 PyTorch-module reference ----
    # bf16 MXU operands bound the deviation to a few 1e-3 absolute here.
    dotf = functools.partial(jnp.dot, precision=jax.lax.Precision.HIGHEST)
    h_f = jnp.maximum(dotf(adj, dotf(x, w1)) + b1, 0.0)
    z_f = dotf(adj, dotf(h_f, w2)) + b2
    assert jnp.allclose(logp, jax.nn.log_softmax(z_f, axis=1), atol=3e-2, rtol=3e-2)
    assert jnp.allclose(prod, dotf(z_f, z_f.T), atol=3e-2, rtol=3e-2)

    print("KERNEL_OK")
</pallas_src>

<mosaic_0001>
module attributes {stable_mosaic.version = 11 : i64} {
  func.func @_gcn_layer1_kernel(%arg0: i32, %arg1: memref<64x16xf32, #tpu.memory_space<vmem>>, %arg2: memref<16x32xf32, #tpu.memory_space<vmem>>, %arg3: memref<1x32xf32, #tpu.memory_space<vmem>>, %arg4: memref<64x64xf32, #tpu.memory_space<vmem>>, %arg5: memref<64x32xf32, #tpu.memory_space<vmem>>) attributes {dimension_semantics = [#tpu.dimension_semantics<parallel>], iteration_bounds = array<i64: 1>, scalar_prefetch = 0 : i64, scratch_operands = 0 : i64, tpu.core_type = #tpu.core_type<tc>, window_params = [{pipeline_mode = #tpu.pipeline_mode<synchronous>, transform_indices = @transform_0, window_bounds = array<i64: 64, 16>}, {pipeline_mode = #tpu.pipeline_mode<synchronous>, transform_indices = @transform_1, window_bounds = array<i64: 16, 32>}, {pipeline_mode = #tpu.pipeline_mode<synchronous>, transform_indices = @transform_2, window_bounds = array<i64: 1, 32>}, {transform_indices = @transform_3, window_bounds = array<i64: 64, 64>}, {transform_indices = @transform_4, window_bounds = array<i64: 64, 32>}]} {
    %c0 = arith.constant 0 : index
    %c0_0 = arith.constant 0 : index
    %0 = vector.load %arg4[%c0, %c0_0] : memref<64x64xf32, #tpu.memory_space<vmem>>, vector<64x64xf32>
    %1 = arith.truncf %0 : vector<64x64xf32> to vector<64x64xbf16>
    %c0_1 = arith.constant 0 : index
    %c0_2 = arith.constant 0 : index
    %2 = vector.load %arg1[%c0_1, %c0_2] : memref<64x16xf32, #tpu.memory_space<vmem>>, vector<64x16xf32>
    %3 = arith.truncf %2 : vector<64x16xf32> to vector<64x16xbf16>
    %cst = arith.constant dense<0.000000e+00> : vector<64x16xf32>
    %4 = tpu.matmul %1, %3, %cst {dimension_numbers = #tpu.dot_dimension_numbers<[1], [0], [0], [1], [0, 0, 1, 1], [], []>} : vector<64x64xbf16>, vector<64x16xbf16>, vector<64x16xf32> -> vector<64x16xf32>
    %5 = arith.truncf %4 : vector<64x16xf32> to vector<64x16xbf16>
    %c0_3 = arith.constant 0 : index
    %c0_4 = arith.constant 0 : index
    %6 = vector.load %arg2[%c0_3, %c0_4] : memref<16x32xf32, #tpu.memory_space<vmem>>, vector<16x32xf32>
    %7 = arith.truncf %6 : vector<16x32xf32> to vector<16x32xbf16>
    %cst_5 = arith.constant dense<0.000000e+00> : vector<64x32xf32>
    %8 = tpu.matmul %5, %7, %cst_5 {dimension_numbers = #tpu.dot_dimension_numbers<[1], [0], [0], [1], [0, 0, 1, 1], [], []>} : vector<64x16xbf16>, vector<16x32xbf16>, vector<64x32xf32> -> vector<64x32xf32>
    %c0_6 = arith.constant 0 : index
    %c0_7 = arith.constant 0 : index
    %9 = vector.load %arg3[%c0_6, %c0_7] : memref<1x32xf32, #tpu.memory_space<vmem>>, vector<1x32xf32>
    %10 = vector.broadcast %9 : vector<1x32xf32> to vector<64x32xf32>
    %11 = arith.addf %8, %10 : vector<64x32xf32>
    %cst_8 = arith.constant 0.000000e+00 : f32
    %12 = vector.broadcast %cst_8 : f32 to vector<64x32xf32>
    %13 = arith.maximumf %11, %12 : vector<64x32xf32>
    %c0_9 = arith.constant 0 : index
    %c0_10 = arith.constant 0 : index
    %14 = vector.load %arg5[%c0_9, %c0_10] : memref<64x32xf32, #tpu.memory_space<vmem>>, vector<64x32xf32>
    tpu.vector_store %arg5[%c0_9, %c0_10], %13 {strides = array<i32>} : memref<64x32xf32, #tpu.memory_space<vmem>>, vector<64x32xf32>,
    return
  }
  func.func @transform_0(%arg0: i32) -> (i32, i32) {
    %c0_i32 = arith.constant 0 : i32
    %c0_i32_0 = arith.constant 0 : i32
    %c0_i32_1 = arith.constant 0 : i32
    return %c0_i32, %c0_i32_0 : i32, i32
  }
  func.func @transform_1(%arg0: i32) -> (i32, i32) {
    %c0_i32 = arith.constant 0 : i32
    %c0_i32_0 = arith.constant 0 : i32
    %c0_i32_1 = arith.constant 0 : i32
    return %c0_i32, %c0_i32_0 : i32, i32
  }
  func.func @transform_2(%arg0: i32) -> (i32, i32) {
    %c0_i32 = arith.constant 0 : i32
    %c0_i32_0 = arith.constant 0 : i32
    %c0_i32_1 = arith.constant 0 : i32
    return %c0_i32, %c0_i32_0 : i32, i32
  }
  func.func @transform_3(%arg0: i32) -> (i32, i32) {
    %c0_i32 = arith.constant 0 : i32
    %c0_i32_0 = arith.constant 0 : i32
    return %arg0, %c0_i32 : i32, i32
  }
  func.func @transform_4(%arg0: i32) -> (i32, i32) {
    %c0_i32 = arith.constant 0 : i32
    %c0_i32_0 = arith.constant 0 : i32
    return %arg0, %c0_i32 : i32, i32
  }
}

</mosaic_0001>

<bundles_post_ra>
// kernel: tpu_custom_call.1
= control target key start
LH: loop header
LB: loop body
LE: loop exit
PB: predicated region body
PF: predicated region fallthrough
CT: control target
= control target key end

     0   :  { %vm42_vm0 = vcmask 523264   ;;  %vm134_vm1 = vcmask 130048   ;;  %vm220_vm2 = vcmask 261120   ;;  %s399_s0 = inlined_call_operand.vmem [shape: f32[64,16], index: 0, kind: input, shape index: {}]   ;;  %s400_s3 = inlined_call_operand.vmem [shape: f32[64,64], index: 3, kind: input, shape index: {}]   ;;  %s401_s1 = inlined_call_operand.vmem [shape: f32[16,32], index: 1, kind: input, shape index: {}]   ;;  %s402_s2 = inlined_call_operand.vmem [shape: f32[1,32], index: 2, kind: input, shape index: {}]   ;;  %s403_s4 = inlined_call_operand.vmem [shape: f32[64,32], index: 4, kind: output, shape index: {}]  }
   0x1   :  { %v30_v0 = vld [vmem:[%s399_s0] sm:$0xff]  ;;  %v31_v1 = vld [vmem:[%s399_s0 + $0x8] sm:$0xff]  ;;  %v32_v2 = vld [vmem:[%s399_s0 + $0x10] sm:$0xff] }
   0x2   :  { %v38_v3 = vpack.c.bf16 %v31_v1, %v30_v0  ;;  %v33_v4 = vld [vmem:[%s399_s0 + $0x18] sm:$0xff]  ;;  %v34_v6 = vld [vmem:[%s399_s0 + $0x20] sm:$0xff]  ;;  %v35_v7 = vld [vmem:[%s399_s0 + $0x28] sm:$0xff] }
   0x3   :  { %v39_v5 = vpack.c.bf16 %v33_v4, %v32_v2  ;;  %v18_v8 = vld [vmem:[%s400_s3] sm:$0xff]  ;;  %v19_v9 = vld [vmem:[%s400_s3 + $0x8] sm:$0xff]  ;;  %v40_v11 = vpack.c.bf16 %v35_v7, %v34_v6  ;;  %v36_v12 = vld [vmem:[%s399_s0 + $0x30] sm:$0xff] }
   0x4   :  { %255 = vmatprep.subr.bf16.mxu0 %v38_v3  ;;  %v26_v10 = vpack.c.bf16 %v19_v9, %v18_v8  ;;  %v37_v13 = vld [vmem:[%s399_s0 + $0x38] sm:$0xff]  ;;  %v20_v15 = vld [vmem:[%s400_s3 + $0x10] sm:$0xff]  ;;  %v22_v17 = vld [vmem:[%s400_s3 + $0x20] sm:$0xff] }
   0x5   :  { %256 = vmatpush3.bf16.msra.mxu0 %v38_v3  ;;  %v41_v14 = vpack.c.bf16 %v37_v13, %v36_v12  ;;  %v21_v16 = vld [vmem:[%s400_s3 + $0x18] sm:$0xff]  ;;  %v23_v18 = vld [vmem:[%s400_s3 + $0x28] sm:$0xff]  ;;  %v24_v21 = vld [vmem:[%s400_s3 + $0x30] sm:$0xff] }
   0x6   :  { %257 = vmatprep.subr.bf16.mxu0 %v39_v5  ;;  %263 = vmatprep.mubr.msk.bf16.mxu0 %vm42_vm0, %v26_v10  ;;  %v27_v19 = vpack.c.bf16 %v21_v16, %v20_v15  ;;  %v28_v20 = vpack.c.bf16 %v23_v18, %v22_v17  ;;  %v25_v22 = vld [vmem:[%s400_s3 + $0x38] sm:$0xff]  ;;  %v124_v24 = vld [vmem:[%s401_s1] sm:$0xff]  ;;  %v125_v25 = vld [vmem:[%s401_s1 + $0x8] sm:$0xff] }
   0x7   :  { %v29_v23 = vpack.c.bf16 %v25_v22, %v24_v21  ;;  %v126_v26 = vpack.c.bf16 %v125_v25, %v124_v24  ;;  %v237_v39 = vld [vmem:[%s402_s2] ss:$0 sm:$0xff] }
   0x9   :  { %258 = vmatpush3.bf16.msra.mxu0 %v39_v5  ;;  %271 = vmatprep.subr.bf16.mxu1 %v126_v26 }
   0xa   :  { %259 = vmatprep.subr.bf16.mxu0 %v40_v11  ;;  %272 = vmatpush3.bf16.msra.mxu1 %v126_v26 }
   0xd   :  { %260 = vmatpush3.bf16.msra.mxu0 %v40_v11 }
   0xe   :  { %261 = vmatprep.subr.bf16.mxu0 %v41_v14 }
  0x11   :  { %262 = vmatpush3.bf16.msra.mxu0 %v41_v14 }
  0x14   :  { %264 = vmatmul.mubr.msk.bf16.vlgmr.msra.gmra.mrb[0].mxu0 %vm42_vm0, %v27_v19 }
  0x15   :  { %267 = vmatprep.mubr.msk.bf16.mxu0 %vm42_vm0, %v28_v20 }
  0x1c   :  { %268 = vmatmul.mubr.msk.bf16.gmra.mrb[4].mxu0 %vm42_vm0, %v29_v23 }
  0xe7   :  { %v265_v27 = vpop.f32.mrb[0].mxu0 }
  0xe8   :  { %v89_v28 = vpop.f32.mrb[1].mxu0 }
  0xe9   :  { %v266_v29 = vpop.f32.mrb[2].mxu0 }
  0xea   :  { %v121_v30 = vpack.c.bf16 %v266_v29, %v265_v27  ;;  %v92_v31 = vpop.f32.mrb[3].mxu0 }
  0xeb   :  { %v120_v32 = vpack.c.bf16 %v92_v31, %v89_v28 }
  0xed   :  { %273 = vmatprep.mubr.msk.bf16.mxu1 %vm134_vm1, %v120_v32 }
  0xee   :  { %274 = vmatmul.mubr.msk.bf16.vlgmr.msra.gmra.mrb[0].mxu1 %vm134_vm1, %v121_v30 }
  0xef   :  { %v269_v33 = vpop.f32.mrb[4].mxu0 }
  0xf0   :  { %v105_v34 = vpop.f32.mrb[5].mxu0 }
  0xf1   :  { %v270_v35 = vpop.f32.mrb[6].mxu0 }
  0xf2   :  { %v123_v36 = vpack.c.bf16 %v270_v35, %v269_v33  ;;  %v108_v37 = vpop.f32.mrb[7].mxu0 }
  0xf3   :  { %v122_v38 = vpack.c.bf16 %v108_v37, %v105_v34 }
  0xf5   :  { %277 = vmatprep.mubr.msk.bf16.mxu1 %vm134_vm1, %v122_v38 }
  0xf6   :  { %278 = vmatmul.mubr.msk.bf16.gmra.mrb[4].mxu1 %vm134_vm1, %v123_v36 }
 0x1c1   :  { %v275_v40 = vpop.f32.mrb[0].mxu1 }
 0x1c2   :  { %v190_v41 = vadd.f32 %v275_v40, %v237_v39  ;;  %v181_v42 = vpop.f32.mrb[1].mxu1 }
 0x1c3   :  { %v182_v43 = vadd.f32 %v237_v39, %v181_v42  ;;  %v276_v44 = vpop.f32.mrb[2].mxu1 }
 0x1c4   :  { %v214_v45 = vmax.f32 %v190_v41, 0.0  ;;  %v193_v46 = vadd.f32 %v276_v44, %v237_v39  ;;  %v184_v47 = vpop.f32.mrb[3].mxu1 }
 0x1c5   :  { %v212_v48 = vmax.f32 %v182_v43, 0.0  ;;  %v185_v49 = vadd.f32 %v237_v39, %v184_v47 }
 0x1c6   :  { %223 = vst.msk [vmem:[%s403_s4 + $0x10] sm:$0xff] %vm220_vm2, %v214_v45  ;;  %v215_v50 = vmax.f32 %v193_v46, 0.0 }
 0x1c7   :  { %221 = vst.msk [vmem:[%s403_s4] sm:$0xff] %vm220_vm2, %v212_v48  ;;  %v213_v51 = vmax.f32 %v185_v49, 0.0 }
 0x1c8   :  { %224 = vst.msk [vmem:[%s403_s4 + $0x18] sm:$0xff] %vm220_vm2, %v215_v50 }
 0x1c9   :  { %222 = vst.msk [vmem:[%s403_s4 + $0x8] sm:$0xff] %vm220_vm2, %v213_v51  ;;  %v279_v52 = vpop.f32.mrb[4].mxu1 }
 0x1ca   :  { %v206_v53 = vadd.f32 %v279_v52, %v237_v39  ;;  %v197_v54 = vpop.f32.mrb[5].mxu1 }
 0x1cb   :  { %v198_v55 = vadd.f32 %v237_v39, %v197_v54  ;;  %v280_v56 = vpop.f32.mrb[6].mxu1 }
 0x1cc   :  { %v218_v57 = vmax.f32 %v206_v53, 0.0  ;;  %v209_v58 = vadd.f32 %v280_v56, %v237_v39  ;;  %v200_v59 = vpop.f32.mrb[7].mxu1 }
 0x1cd   :  { %v216_v60 = vmax.f32 %v198_v55, 0.0  ;;  %v201_v61 = vadd.f32 %v237_v39, %v200_v59 }
 0x1ce   :  { %227 = vst.msk [vmem:[%s403_s4 + $0x30] sm:$0xff] %vm220_vm2, %v218_v57  ;;  %v219_v62 = vmax.f32 %v209_v58, 0.0 }
 0x1cf   :  { %225 = vst.msk [vmem:[%s403_s4 + $0x20] sm:$0xff] %vm220_vm2, %v216_v60  ;;  %v217_v63 = vmax.f32 %v201_v61, 0.0 }
 0x1d0   :  { %228 = vst.msk [vmem:[%s403_s4 + $0x38] sm:$0xff] %vm220_vm2, %v219_v62 }
 0x1d1   :  { %226 = vst.msk [vmem:[%s403_s4 + $0x28] sm:$0xff] %vm220_vm2, %v217_v63 }

</bundles_post_ra>
